<compile_context>
chip_gen: v7x
topology: tpu7x:2x2x1
jax: 0.10.0
libtpu: 0.0.40
codegen_flags: <defaults>
</compile_context>

<pallas_src>
import functools

import jax
import jax.numpy as jnp
from jax.experimental import pallas as pl
from jax.experimental.pallas import tpu as pltpu


def _round_up(x, m):
    return (x + m - 1) // m * m


def ffn_kernel(x_ref, w1_ref, w2_ref, gamma_ref, beta_ref, out_ref, xb_ref,
               *, d_model, needs_lane_mask):
    """One (token-tile i, d_ff-slab k) grid step of the fused FFN.

    x_ref:     (TM, Dp)  f32   token tile (block index constant across k)
    w1_ref:    (Dp, TF)  bf16  columns [k*TF, (k+1)*TF) of W1
    w2_ref:    (TF, Dp)  bf16  rows    [k*TF, (k+1)*TF) of W2
    gamma_ref: (1, Dp)   f32
    beta_ref:  (1, Dp)   f32
    out_ref:   (TM, Dp)  f32   VMEM-resident across k; used as the accumulator
    xb_ref:    (TM, Dp)  bf16  cached bf16 cast of the token tile
    """
    k = pl.program_id(1)

    # Cache the bf16 cast of the token tile once per token tile and reuse it
    # for every d_ff slab (no per-step f32 reload + VPU cast).
    @pl.when(k == 0)
    def _():
        xb_ref[...] = x_ref[...].astype(jnp.bfloat16)

    # Linear1 -> ReLU for this d_ff slab (bf16 MXU operands, f32 accumulate).
    h = jnp.dot(xb_ref[...], w1_ref[...], preferred_element_type=jnp.float32)
    h = jnp.maximum(h, 0.0).astype(jnp.bfloat16)
    # Partial Linear2 contribution of this slab.
    contrib = jnp.dot(h, w2_ref[...], preferred_element_type=jnp.float32)

    # Accumulate directly into the VMEM-resident output block: first slab is a
    # direct store (no zero-fill + add), later slabs accumulate.
    @pl.when(k == 0)
    def _():
        out_ref[...] = contrib

    @pl.when(k > 0)
    def _():
        out_ref[...] += contrib

    @pl.when(k == pl.num_programs(1) - 1)
    def _():
        # Residual + LayerNorm, all f32.  Padded lanes of x and the
        # accumulator are exact zeros, so summing over the padded lane axis
        # and dividing by the true d_model gives the exact mean.
        y = out_ref[...] + x_ref[...]
        inv_d = 1.0 / d_model
        mean = jnp.sum(y, axis=-1, keepdims=True) * inv_d
        centered = y - mean
        if needs_lane_mask:
            lane = jax.lax.broadcasted_iota(jnp.int32, y.shape, 1)
            centered = jnp.where(lane < d_model, centered, 0.0)
        var = jnp.sum(centered * centered, axis=-1, keepdims=True) * inv_d
        inv_std = jax.lax.rsqrt(var + 1e-5)  # eps matches PyTorch LayerNorm
        out_ref[...] = (centered * inv_std * gamma_ref[...]
                        + beta_ref[...]).astype(out_ref.dtype)


def _hardware_info():
    """Best-effort (kind, vmem_capacity, is_v7, is_v5) query with fallbacks."""
    kind = ""
    try:
        kind = jax.devices()[0].device_kind.lower()
    except Exception:
        pass
    is_v7 = ("v7" in kind) or ("7x" in kind)
    is_v5 = "v5" in kind
    vmem_cap = None
    try:
        vmem_cap = int(pltpu.get_tpu_info().vmem_capacity_bytes)
    except Exception:
        vmem_cap = None
    if vmem_cap is None or vmem_cap <= 0:
        vmem_cap = (64 << 20) if is_v7 else (128 << 20)
    return kind, vmem_cap, is_v7, is_v5


def _choose_tiles(n, d_model_pad, d_ff128, vmem_cap, is_v7, is_v5):
    """Pick (tm, tf, vmem_estimate) per generation under the VMEM budget."""
    # tf candidates must be multiples of 128 and divide the padded d_ff so no
    # all-zero weight slabs are streamed/multiplied.
    tf_opts = [c for c in (512, 384, 256, 128) if d_ff128 % c == 0]
    tf_i = 0

    # Token-tile targets: v6e ridge ~650 flops/byte -> TM~1024;
    # v7x per-TC ridge ~310 and v5e ~240 -> TM~512.
    tm = 512 if (is_v7 or is_v5) else 1024
    tm = max(8, min(tm, _round_up(n, 8)))

    budget = int(vmem_cap * 0.85)

    def est(tm_, tf_):
        dp = d_model_pad
        stream = 2 * (tm_ * dp * 4        # x tile (f32), double buffered
                      + dp * tf_ * 2      # w1 slab (bf16)
                      + tf_ * dp * 2      # w2 slab (bf16)
                      + tm_ * dp * 4      # out tile / accumulator (f32)
                      + 2 * dp * 4)       # gamma / beta
        return stream + tm_ * dp * 2      # bf16 x-cache scratch

    # Shrink weight slab first (keep >=256 if possible), then TM, then the
    # rest — never just clamp the limit below the real footprint.
    while est(tm, tf_opts[tf_i]) > budget:
        if tf_i + 1 < len(tf_opts) and tf_opts[tf_i + 1] >= 256:
            tf_i += 1
        elif tm > 256:
            tm = max(256, tm // 2)
        elif tf_i + 1 < len(tf_opts):
            tf_i += 1
        elif tm > 64:
            tm = max(64, tm // 2)
        else:
            break

    tf = tf_opts[tf_i]
    return tm, tf, est(tm, tf)


def poswise_ffn(x, w1, w2, gamma, beta):
    """x: (batch, seq, d_model) f32; w1: (d_model, d_ff); w2: (d_ff, d_model)."""
    batch, seq, d_model = x.shape
    d_ff = w1.shape[1]
    n = batch * seq

    # ---- TPU-friendly shapes (all padding is exact zero) ----
    d_model_pad = _round_up(d_model, 128)       # lane-dense loads/stores
    d_ff128 = _round_up(d_ff, 128)

    kind, vmem_cap, is_v7, is_v5 = _hardware_info()
    tm, tf, vmem_est = _choose_tiles(n, d_model_pad, d_ff128, vmem_cap,
                                     is_v7, is_v5)

    n_pad = _round_up(n, tm)
    d_ff_pad = d_ff128                          # tf divides d_ff_pad by construction

    x2d = jnp.pad(x.reshape(n, d_model),
                  ((0, n_pad - n), (0, d_model_pad - d_model)))
    w1_p = jnp.pad(w1, ((0, d_model_pad - d_model),
                        (0, d_ff_pad - d_ff))).astype(jnp.bfloat16)
    w2_p = jnp.pad(w2, ((0, d_ff_pad - d_ff),
                        (0, d_model_pad - d_model))).astype(jnp.bfloat16)
    gamma_p = jnp.pad(gamma, (0, d_model_pad - d_model)).reshape(1, d_model_pad)
    beta_p = jnp.pad(beta, (0, d_model_pad - d_model)).reshape(1, d_model_pad)

    grid = (n_pad // tm, d_ff_pad // tf)

    # Scoped-VMEM limit sized from the actual footprint (plus headroom for
    # compiler-internal scratch), never above physical capacity.
    vmem_limit = max(min(vmem_est + (16 << 20), vmem_cap),
                     min(32 << 20, vmem_cap))

    kernel = functools.partial(
        ffn_kernel,
        d_model=d_model,
        needs_lane_mask=(d_model_pad != d_model),
    )

    out2d = pl.pallas_call(
        kernel,
        out_shape=jax.ShapeDtypeStruct((n_pad, d_model_pad), x.dtype),
        grid_spec=pltpu.PrefetchScalarGridSpec(
            num_scalar_prefetch=0,
            grid=grid,
            in_specs=[
                pl.BlockSpec((tm, d_model_pad), lambda i, k: (i, 0)),  # x tile
                pl.BlockSpec((d_model_pad, tf), lambda i, k: (0, k)),  # w1 slab
                pl.BlockSpec((tf, d_model_pad), lambda i, k: (k, 0)),  # w2 slab
                pl.BlockSpec((1, d_model_pad), lambda i, k: (0, 0)),   # gamma
                pl.BlockSpec((1, d_model_pad), lambda i, k: (0, 0)),   # beta
            ],
            out_specs=pl.BlockSpec((tm, d_model_pad), lambda i, k: (i, 0)),
            scratch_shapes=[pltpu.VMEM((tm, d_model_pad), jnp.bfloat16)],
        ),
        compiler_params=pltpu.CompilerParams(
            dimension_semantics=("parallel", "arbitrary"),
            vmem_limit_bytes=int(vmem_limit),
        ),
    )(x2d, w1_p, w2_p, gamma_p, beta_p)

    return out2d[:n, :d_model].reshape(batch, seq, d_model)


def reference_ffn(x, w1, w2, gamma, beta):
    """Pure-JAX f32 reference matching the PyTorch forward."""
    h = jnp.maximum(x @ w1, 0.0)
    y = h @ w2 + x
    mean = jnp.mean(y, axis=-1, keepdims=True)
    var = jnp.mean((y - mean) ** 2, axis=-1, keepdims=True)
    return gamma * (y - mean) / jnp.sqrt(var + 1e-5) + beta


if __name__ == "__main__":
    # Small, deterministic problem: p = {'d_model': 32, 'd_ff': 64}
    batch, seq, d_model, d_ff = 2, 8, 32, 64

    key = jax.random.PRNGKey(0)
    kx, kw1, kw2, kg, kb = jax.random.split(key, 5)

    x = jax.random.normal(kx, (batch, seq, d_model), dtype=jnp.float32)
    # Linear weights stored as (in, out); PyTorch stores (out, in) — transposed view.
    w1 = jax.random.normal(kw1, (d_model, d_ff), dtype=jnp.float32) * (1.0 / d_model ** 0.5)
    w2 = jax.random.normal(kw2, (d_ff, d_model), dtype=jnp.float32) * (1.0 / d_ff ** 0.5)
    # LayerNorm affine params (perturbed around PyTorch defaults 1 / 0, deterministic).
    gamma = 1.0 + 0.1 * jax.random.normal(kg, (d_model,), dtype=jnp.float32)
    beta = 0.1 * jax.random.normal(kb, (d_model,), dtype=jnp.float32)

    out = poswise_ffn(x, w1, w2, gamma, beta)
    out = jax.block_until_ready(out)

    ref = reference_ffn(x, w1, w2, gamma, beta)
    assert out.shape == (batch, seq, d_model)
    assert bool(jnp.all(jnp.isfinite(out))), "non-finite values in kernel output"
    # bf16 MXU operands (f32 accumulation / LayerNorm) -> loosened tolerance
    # vs the f32-exact PyTorch reference.
    assert jnp.allclose(out, ref, atol=5e-2, rtol=5e-2), "mismatch vs reference"

    print("KERNEL_OK")
</pallas_src>

<mosaic_0001>
module attributes {stable_mosaic.version = 11 : i64} {
  func.func @ffn_kernel(%arg0: i32, %arg1: i32, %arg2: memref<16x128xf32, #tpu.memory_space<vmem>>, %arg3: memref<128x128xbf16, #tpu.memory_space<vmem>>, %arg4: memref<128x128xbf16, #tpu.memory_space<vmem>>, %arg5: memref<1x128xf32, #tpu.memory_space<vmem>>, %arg6: memref<1x128xf32, #tpu.memory_space<vmem>>, %arg7: memref<16x128xf32, #tpu.memory_space<vmem>>, %arg8: memref<16x128xbf16, #tpu.memory_space<vmem>>) attributes {dimension_semantics = [#tpu.dimension_semantics<parallel>, #tpu.dimension_semantics<arbitrary>], iteration_bounds = array<i64: 1, 1>, scalar_prefetch = 0 : i64, scratch_operands = 1 : i64, tpu.core_type = #tpu.core_type<tc>, window_params = [{transform_indices = @transform_0, window_bounds = array<i64: 16, 128>}, {transform_indices = @transform_1, window_bounds = array<i64: 128, 128>}, {transform_indices = @transform_2, window_bounds = array<i64: 128, 128>}, {pipeline_mode = #tpu.pipeline_mode<synchronous>, transform_indices = @transform_3, window_bounds = array<i64: 1, 128>}, {pipeline_mode = #tpu.pipeline_mode<synchronous>, transform_indices = @transform_4, window_bounds = array<i64: 1, 128>}, {transform_indices = @transform_5, window_bounds = array<i64: 16, 128>}]} {
    %c0_i32 = arith.constant 0 : i32
    %0 = arith.cmpi eq, %arg1, %c0_i32 : i32
    %1 = arith.extui %0 : i1 to i32
    %c0_i32_0 = arith.constant 0 : i32
    %2 = arith.cmpi ne, %1, %c0_i32_0 : i32
    scf.if %2 {
      %c0_14 = arith.constant 0 : index
      %c0_15 = arith.constant 0 : index
      %20 = vector.load %arg2[%c0_14, %c0_15] : memref<16x128xf32, #tpu.memory_space<vmem>>, vector<16x128xf32>
      %21 = arith.truncf %20 : vector<16x128xf32> to vector<16x128xbf16>
      %c0_16 = arith.constant 0 : index
      %c0_17 = arith.constant 0 : index
      %22 = vector.load %arg8[%c0_16, %c0_17] : memref<16x128xbf16, #tpu.memory_space<vmem>>, vector<16x128xbf16>
      tpu.vector_store %arg8[%c0_16, %c0_17], %21 {strides = array<i32>} : memref<16x128xbf16, #tpu.memory_space<vmem>>, vector<16x128xbf16>,
    } else {
    }
    %c0 = arith.constant 0 : index
    %c0_1 = arith.constant 0 : index
    %3 = vector.load %arg8[%c0, %c0_1] : memref<16x128xbf16, #tpu.memory_space<vmem>>, vector<16x128xbf16>
    %c0_2 = arith.constant 0 : index
    %c0_3 = arith.constant 0 : index
    %4 = vector.load %arg3[%c0_2, %c0_3] : memref<128x128xbf16, #tpu.memory_space<vmem>>, vector<128x128xbf16>
    %cst = arith.constant dense<0.000000e+00> : vector<16x128xf32>
    %5 = tpu.matmul %3, %4, %cst {dimension_numbers = #tpu.dot_dimension_numbers<[1], [0], [0], [1], [0, 0, 1, 1], [], []>} : vector<16x128xbf16>, vector<128x128xbf16>, vector<16x128xf32> -> vector<16x128xf32>
    %cst_4 = arith.constant 0.000000e+00 : f32
    %6 = vector.broadcast %cst_4 : f32 to vector<16x128xf32>
    %7 = arith.maximumf %5, %6 : vector<16x128xf32>
    %8 = arith.truncf %7 : vector<16x128xf32> to vector<16x128xbf16>
    %c0_5 = arith.constant 0 : index
    %c0_6 = arith.constant 0 : index
    %9 = vector.load %arg4[%c0_5, %c0_6] : memref<128x128xbf16, #tpu.memory_space<vmem>>, vector<128x128xbf16>
    %cst_7 = arith.constant dense<0.000000e+00> : vector<16x128xf32>
    %10 = tpu.matmul %8, %9, %cst_7 {dimension_numbers = #tpu.dot_dimension_numbers<[1], [0], [0], [1], [0, 0, 1, 1], [], []>} : vector<16x128xbf16>, vector<128x128xbf16>, vector<16x128xf32> -> vector<16x128xf32>
    %c0_i32_8 = arith.constant 0 : i32
    %11 = arith.cmpi eq, %arg1, %c0_i32_8 : i32
    %12 = arith.extui %11 : i1 to i32
    %c0_i32_9 = arith.constant 0 : i32
    %13 = arith.cmpi ne, %12, %c0_i32_9 : i32
    scf.if %13 {
      %c0_14 = arith.constant 0 : index
      %c0_15 = arith.constant 0 : index
      %20 = vector.load %arg7[%c0_14, %c0_15] : memref<16x128xf32, #tpu.memory_space<vmem>>, vector<16x128xf32>
      tpu.vector_store %arg7[%c0_14, %c0_15], %10 {strides = array<i32>} : memref<16x128xf32, #tpu.memory_space<vmem>>, vector<16x128xf32>,
    } else {
    }
    %c0_i32_10 = arith.constant 0 : i32
    %14 = arith.cmpi sgt, %arg1, %c0_i32_10 : i32
    %15 = arith.extui %14 : i1 to i32
    %c0_i32_11 = arith.constant 0 : i32
    %16 = arith.cmpi ne, %15, %c0_i32_11 : i32
    scf.if %16 {
      %c0_14 = arith.constant 0 : index
      %c0_15 = arith.constant 0 : index
      %20 = vector.load %arg7[%c0_14, %c0_15] : memref<16x128xf32, #tpu.memory_space<vmem>>, vector<16x128xf32>
      %21 = arith.addf %20, %10 : vector<16x128xf32>
      %c0_16 = arith.constant 0 : index
      %c0_17 = arith.constant 0 : index
      %22 = vector.load %arg7[%c0_16, %c0_17] : memref<16x128xf32, #tpu.memory_space<vmem>>, vector<16x128xf32>
      tpu.vector_store %arg7[%c0_16, %c0_17], %21 {strides = array<i32>} : memref<16x128xf32, #tpu.memory_space<vmem>>, vector<16x128xf32>,
    } else {
    }
    %c0_i32_12 = arith.constant 0 : i32
    %17 = arith.cmpi eq, %arg1, %c0_i32_12 : i32
    %18 = arith.extui %17 : i1 to i32
    %c0_i32_13 = arith.constant 0 : i32
    %19 = arith.cmpi ne, %18, %c0_i32_13 : i32
    scf.if %19 {
      %c0_14 = arith.constant 0 : index
      %c0_15 = arith.constant 0 : index
      %20 = vector.load %arg7[%c0_14, %c0_15] : memref<16x128xf32, #tpu.memory_space<vmem>>, vector<16x128xf32>
      %c0_16 = arith.constant 0 : index
      %c0_17 = arith.constant 0 : index
      %21 = vector.load %arg2[%c0_16, %c0_17] : memref<16x128xf32, #tpu.memory_space<vmem>>, vector<16x128xf32>
      %22 = arith.addf %20, %21 : vector<16x128xf32>
      %cst_18 = arith.constant dense<0.000000e+00> : vector<16xf32>
      %23 = vector.multi_reduction <add>, %22, %cst_18 [1] : vector<16x128xf32> to vector<16xf32>
      %24 = vector.shape_cast %23 : vector<16xf32> to vector<16x1xf32>
      %cst_19 = arith.constant 3.125000e-02 : f32
      %25 = vector.broadcast %cst_19 : f32 to vector<16x1xf32>
      %26 = arith.mulf %24, %25 : vector<16x1xf32>
      %27 = vector.broadcast %26 : vector<16x1xf32> to vector<16x128xf32>
      %28 = arith.subf %22, %27 : vector<16x128xf32>
      %29 = tpu.iota {dimensions = array<i32: 1>} : vector<16x128xi32>
      %c32_i32 = arith.constant 32 : i32
      %30 = vector.broadcast %c32_i32 : i32 to vector<16x128xi32>
      %31 = arith.cmpi slt, %29, %30 : vector<16x128xi32>
      %cst_20 = arith.constant 0.000000e+00 : f32
      %32 = vector.broadcast %cst_20 : f32 to vector<16x128xf32>
      %33 = arith.select %31, %28, %32 : vector<16x128xi1>, vector<16x128xf32>
      %34 = arith.mulf %33, %33 : vector<16x128xf32>
      %cst_21 = arith.constant dense<0.000000e+00> : vector<16xf32>
      %35 = vector.multi_reduction <add>, %34, %cst_21 [1] : vector<16x128xf32> to vector<16xf32>
      %36 = vector.shape_cast %35 : vector<16xf32> to vector<16x1xf32>
      %cst_22 = arith.constant 3.125000e-02 : f32
      %37 = vector.broadcast %cst_22 : f32 to vector<16x1xf32>
      %38 = arith.mulf %36, %37 : vector<16x1xf32>
      %cst_23 = arith.constant 9.99999974E-6 : f32
      %39 = vector.broadcast %cst_23 : f32 to vector<16x1xf32>
      %40 = arith.addf %38, %39 : vector<16x1xf32>
      %41 = math.rsqrt %40 : vector<16x1xf32>
      %42 = vector.broadcast %41 : vector<16x1xf32> to vector<16x128xf32>
      %43 = arith.mulf %33, %42 : vector<16x128xf32>
      %c0_24 = arith.constant 0 : index
      %c0_25 = arith.constant 0 : index
      %44 = vector.load %arg5[%c0_24, %c0_25] : memref<1x128xf32, #tpu.memory_space<vmem>>, vector<1x128xf32>
      %45 = vector.broadcast %44 : vector<1x128xf32> to vector<16x128xf32>
      %46 = arith.mulf %43, %45 : vector<16x128xf32>
      %c0_26 = arith.constant 0 : index
      %c0_27 = arith.constant 0 : index
      %47 = vector.load %arg6[%c0_26, %c0_27] : memref<1x128xf32, #tpu.memory_space<vmem>>, vector<1x128xf32>
      %48 = vector.broadcast %47 : vector<1x128xf32> to vector<16x128xf32>
      %49 = arith.addf %46, %48 : vector<16x128xf32>
      %c0_28 = arith.constant 0 : index
      %c0_29 = arith.constant 0 : index
      %50 = vector.load %arg7[%c0_28, %c0_29] : memref<16x128xf32, #tpu.memory_space<vmem>>, vector<16x128xf32>
      tpu.vector_store %arg7[%c0_28, %c0_29], %49 {strides = array<i32>} : memref<16x128xf32, #tpu.memory_space<vmem>>, vector<16x128xf32>,
    } else {
    }
    return
  }
  func.func @transform_0(%arg0: i32, %arg1: i32) -> (i32, i32) {
    %c0_i32 = arith.constant 0 : i32
    %c0_i32_0 = arith.constant 0 : i32
    return %arg0, %c0_i32 : i32, i32
  }
  func.func @transform_1(%arg0: i32, %arg1: i32) -> (i32, i32) {
    %c0_i32 = arith.constant 0 : i32
    %c0_i32_0 = arith.constant 0 : i32
    return %c0_i32, %arg1 : i32, i32
  }
  func.func @transform_2(%arg0: i32, %arg1: i32) -> (i32, i32) {
    %c0_i32 = arith.constant 0 : i32
    %c0_i32_0 = arith.constant 0 : i32
    return %arg1, %c0_i32 : i32, i32
  }
  func.func @transform_3(%arg0: i32, %arg1: i32) -> (i32, i32) {
    %c0_i32 = arith.constant 0 : i32
    %c0_i32_0 = arith.constant 0 : i32
    %c0_i32_1 = arith.constant 0 : i32
    return %c0_i32, %c0_i32_0 : i32, i32
  }
  func.func @transform_4(%arg0: i32, %arg1: i32) -> (i32, i32) {
    %c0_i32 = arith.constant 0 : i32
    %c0_i32_0 = arith.constant 0 : i32
    %c0_i32_1 = arith.constant 0 : i32
    return %c0_i32, %c0_i32_0 : i32, i32
  }
  func.func @transform_5(%arg0: i32, %arg1: i32) -> (i32, i32) {
    %c0_i32 = arith.constant 0 : i32
    %c0_i32_0 = arith.constant 0 : i32
    return %arg0, %c0_i32 : i32, i32
  }
}

</mosaic_0001>

<bundles_post_ra>
// kernel: tpu_custom_call.1
= control target key start
LH: loop header
LB: loop body
LE: loop exit
PB: predicated region body
PF: predicated region fallthrough
CT: control target
= control target key end

     0   :  { %10 = vsyncpa [#allocation4], 0  ;;  %s680_s0 = inlined_call_operand.hbm [shape: f32[16,128], index: 0, kind: input, shape index: {}]   ;;  %s681_s1 = inlined_call_operand.hbm [shape: bf16[128,128], index: 1, kind: input, shape index: {}]   ;;  %s682_s2 = inlined_call_operand.hbm [shape: bf16[128,128], index: 2, kind: input, shape index: {}]   ;;  %s683_s3 = inlined_call_operand.vmem [shape: f32[1,128], index: 3, kind: input, shape index: {}]   ;;  %s684_s4 = inlined_call_operand.vmem [shape: f32[1,128], index: 4, kind: input, shape index: {}]   ;;  %s685_s5 = inlined_call_operand.hbm [shape: f32[16,128], index: 5, kind: output, shape index: {}]  }
   0x1   :  { %11 = vsyncpa [#allocation7], 0 }
   0x2   :  { %12 = vsyncpa [#allocation5], 0  ;;  %s574_s18 = smov [#allocation6]   ;;  %s480_s22 = scalar_lea.hbm %s681_s1, 1024 }
   0x3   :  { %s30_s19 = sshll.u32 %s574_s18, 4  ;;  %p481_p0 = scmp.ne.s32.totalorder %s681_s1, %s480_s22  ;;  %s31_s19 = int_to_ptr.vmem [resolvable:$true] %s30_s19 }
   0x4   :  { %p484_p1 = scmp.lt.u32.totalorder %s480_s22, %s681_s1 }
   0x6   :  { %p486_p2 = pnand %p484_p1, %p481_p0 }
   0x8   :  { %489 = shalt.err (!%p486_p2)
}
   0x9   :  { %s490_s27 = scalar_lea.vmem %s31_s19, 1024  ;;  %p495_p4 = scmp.lt.s32.totalorder %s31_s19, %s31_s19 }
   0xa   :  { %p491_p3 = scmp.ne.s32.totalorder %s31_s19, %s490_s27  ;;  %p496_p5 = scmp.lt.s32.totalorder %s490_s27, %s490_s27 }
   0xc   :  { %p497_p6 = por %p496_p5, %p495_p4 }
   0xe   :  { %p498_p7 = pnand %p497_p6, %p491_p3 }
  0x10   :  { %501 = shalt.err (!%p498_p7)
}
  0x11   :  { %s575_s28 = smov 64   ;;  %s576_s29 = smov 4  }
  0x12   :  { %36 = dma.hbm_to_vmem [thread:$0]  %s681_s1, 1024, %s31_s19, [#allocation7], %s575_s28, %s575_s28, %s576_s29  }
  0x13   :  { %s577_s7 = smov [#allocation3]   ;;  %s502_s11 = scalar_lea.hbm %s680_s0, 256 }
  0x14   :  { %s18_s8 = sshll.u32 %s577_s7, 4  ;;  %p503_p8 = scmp.ne.s32.totalorder %s680_s0, %s502_s11  ;;  %s19_s8 = int_to_ptr.vmem [resolvable:$true] %s18_s8 }
  0x15   :  { %p506_p9 = scmp.lt.u32.totalorder %s502_s11, %s680_s0 }
  0x17   :  { %p508_p10 = pnand %p506_p9, %p503_p8 }
  0x19   :  { %511 = shalt.err (!%p508_p10)
}
  0x1a   :  { %s512_s16 = scalar_lea.vmem %s19_s8, 256  ;;  %p517_p12 = scmp.lt.s32.totalorder %s19_s8, %s19_s8 }
  0x1b   :  { %p513_p11 = scmp.ne.s32.totalorder %s19_s8, %s512_s16  ;;  %p518_p13 = scmp.lt.s32.totalorder %s512_s16, %s512_s16 }
  0x1d   :  { %p519_p0 = por %p518_p13, %p517_p12 }
  0x1f   :  { %p520_p1 = pnand %p519_p0, %p513_p11 }
  0x21   :  { %523 = shalt.err (!%p520_p1)
}
  0x22   :  { %s578_s1 = smov 128   ;;  %s579_s17 = smov 8  }
  0x23   :  { %24 = dma.hbm_to_vmem [thread:$0]  %s680_s0, 256, %s19_s8, [#allocation4], %s578_s1, %s578_s1, %s579_s17  }
  0x24   :  { %s580_s20 = smov [#allocation8]   ;;  %s524_s24 = scalar_lea.hbm %s682_s2, 1024 }
  0x25   :  { %s42_s21 = sshll.u32 %s580_s20, 4  ;;  %p525_p2 = scmp.ne.s32.totalorder %s682_s2, %s524_s24  ;;  %s43_s21 = int_to_ptr.vmem [resolvable:$true] %s42_s21 }
  0x26   :  { %p528_p3 = scmp.lt.u32.totalorder %s524_s24, %s682_s2 }
  0x28   :  { %p530_p4 = pnand %p528_p3, %p525_p2 }
  0x2a   :  { %533 = shalt.err (!%p530_p4)
}
  0x2b   :  { %s534_s6 = scalar_lea.vmem %s43_s21, 1024  ;;  %p539_p6 = scmp.lt.s32.totalorder %s43_s21, %s43_s21 }
  0x2c   :  { %p535_p5 = scmp.ne.s32.totalorder %s43_s21, %s534_s6  ;;  %p540_p7 = scmp.lt.s32.totalorder %s534_s6, %s534_s6 }
  0x2e   :  { %p541_p8 = por %p540_p7, %p539_p6 }
  0x30   :  { %p542_p9 = pnand %p541_p8, %p535_p5 }
  0x32   :  { %545 = shalt.err (!%p542_p9)
}
  0x33   :  { %48 = dma.hbm_to_vmem [thread:$0]  %s682_s2, 1024, %s43_s21, [#allocation7], %s575_s28, %s575_s28, %s576_s29  }
  0x34   :  { %568 = dma.done.wait [#allocation4], 256  }
  0x35   :  { %569 = vsyncadd [#allocation4], 4294967040 }
  0x36   :  { %570 = dma.done.wait [#allocation7], 2048  }
  0x37   :  { %571 = vsyncadd [#allocation7], 4294965248  ;;  %v581_v0 = vmov 0.0   ;;  %vm582_vm0 = vmmov 0   ;;  %v460_v1 = vld [vmem:[#allocation6] sm:$0xff]   ;;  %v461_v2 = vld [vmem:[#allocation6 + $0x8] sm:$0xff]   ;;  %v317_v33 = vlaneseq }
  0x38   :  { %410 = vmatprep.subr.bf16.mxu0 %v581_v0  ;;  %426 = vmatprep.mubr.msk.bf16.mxu0 %vm582_vm0, %v581_v0  ;;  %v462_v3 = vld [vmem:[#allocation6 + $0x10] sm:$0xff]   ;;  %v468_v4 = vld [vmem:[#allocation8] sm:$0xff]   ;;  %v463_v5 = vld [vmem:[#allocation6 + $0x18] sm:$0xff]   ;;  %s583_s9 = smov [#allocation9]  }
  0x39   :  { %430 = vmatprep.subr.bf16.mxu1 %v581_v0  ;;  %446 = vmatprep.mubr.msk.bf16.mxu1 %vm582_vm0, %v581_v0  ;;  %v469_v6 = vld [vmem:[#allocation8 + $0x8] sm:$0xff]   ;;  %v464_v7 = vld [vmem:[#allocation6 + $0x20] sm:$0xff]   ;;  %v470_v8 = vld [vmem:[#allocation8 + $0x10] sm:$0xff]   ;;  %v318_v34 = vand.u32 127, %v317_v33  ;;  %s361_s10 = sshll.u32 %s583_s9, 4  ;;  %s362_s10 = int_to_ptr.vmem [resolvable:$true] %s361_s10 }
  0x3a   :  { %411 = vmatpush3.bf16.msra.mxu0 %v460_v1  ;;  %431 = vmatpush3.bf16.msra.mxu1 %v468_v4  ;;  %v465_v9 = vld [vmem:[#allocation6 + $0x28] sm:$0xff]   ;;  %v471_v10 = vld [vmem:[#allocation8 + $0x18] sm:$0xff]   ;;  %v466_v11 = vld [vmem:[#allocation6 + $0x30] sm:$0xff]   ;;  %s546_s11 = scalar_lea.vmem %s362_s10, 256  ;;  %p551_p11 = scmp.lt.s32.totalorder %s362_s10, %s362_s10 }
  0x3b   :  { %412 = vmatprep.subr.bf16.mxu0 %v581_v0  ;;  %432 = vmatprep.subr.bf16.mxu1 %v581_v0  ;;  %v472_v12 = vld [vmem:[#allocation8 + $0x20] sm:$0xff]   ;;  %v467_v13 = vld [vmem:[#allocation6 + $0x38] sm:$0xff]   ;;  %v67_v14 = vld [vmem:[#allocation3] sm:$0xff]  ;;  %vm319_vm1 = vcmp.lt.s32.totalorder %v318_v34, 32  ;;  %p547_p10 = scmp.ne.s32.totalorder %s362_s10, %s546_s11  ;;  %p552_p12 = scmp.lt.s32.totalorder %s546_s11, %s546_s11 }
  0x3c   :  { %v68_v15 = vld [vmem:[#allocation3 + $0x8] sm:$0xff]  ;;  %v473_v16 = vld [vmem:[#allocation8 + $0x28] sm:$0xff]   ;;  %v474_v18 = vld [vmem:[#allocation8 + $0x30] sm:$0xff]  }
  0x3d   :  { %v69_v17 = vpack.c.bf16 %v68_v15, %v67_v14  ;;  %v475_v19 = vld [vmem:[#allocation8 + $0x38] sm:$0xff]   ;;  %v390_v52 = vld [vmem:[%s683_s3] ss:$0 sm:$0xff]  ;;  %p553_p13 = por %p552_p12, %p551_p11 }
  0x3e   :  { %413 = vmatpush3.bf16.msra.mxu0 %v461_v2  ;;  %433 = vmatpush3.bf16.msra.mxu1 %v469_v6  ;;  %v391_v54 = vld [vmem:[%s684_s4] ss:$0 sm:$0xff] }
  0x3f   :  { %414 = vmatprep.subr.bf16.mxu0 %v581_v0  ;;  %434 = vmatprep.subr.bf16.mxu1 %v581_v0  ;;  %p554_p0 = pnand %p553_p13, %p547_p10 }
  0x42   :  { %415 = vmatpush3.bf16.msra.mxu0 %v462_v3  ;;  %435 = vmatpush3.bf16.msra.mxu1 %v470_v8 }
  0x43   :  { %416 = vmatprep.subr.bf16.mxu0 %v581_v0  ;;  %436 = vmatprep.subr.bf16.mxu1 %v581_v0 }
  0x46   :  { %417 = vmatpush3.bf16.msra.mxu0 %v463_v5  ;;  %437 = vmatpush3.bf16.msra.mxu1 %v471_v10 }
  0x47   :  { %418 = vmatprep.subr.bf16.mxu0 %v581_v0  ;;  %438 = vmatprep.subr.bf16.mxu1 %v581_v0 }
  0x4a   :  { %419 = vmatpush3.bf16.msra.mxu0 %v464_v7  ;;  %439 = vmatpush3.bf16.msra.mxu1 %v472_v12 }
  0x4b   :  { %420 = vmatprep.subr.bf16.mxu0 %v581_v0  ;;  %440 = vmatprep.subr.bf16.mxu1 %v581_v0 }
  0x4e   :  { %421 = vmatpush3.bf16.msra.mxu0 %v465_v9  ;;  %441 = vmatpush3.bf16.msra.mxu1 %v473_v16 }
  0x4f   :  { %422 = vmatprep.subr.bf16.mxu0 %v581_v0  ;;  %442 = vmatprep.subr.bf16.mxu1 %v581_v0 }
  0x52   :  { %423 = vmatpush3.bf16.msra.mxu0 %v466_v11  ;;  %443 = vmatpush3.bf16.msra.mxu1 %v474_v18 }
  0x53   :  { %424 = vmatprep.subr.bf16.mxu0 %v581_v0  ;;  %444 = vmatprep.subr.bf16.mxu1 %v581_v0 }
  0x56   :  { %425 = vmatpush3.bf16.msra.mxu0 %v467_v13  ;;  %445 = vmatpush3.bf16.msra.mxu1 %v475_v19 }
  0x59   :  { %427 = vmatmul.mubr.bf16.vlgmr.msra.gmra.mrb[0].mxu0 %v69_v17 }
 0x12c   :  { %v170_v20 = vpop.f32.mrb[0].mxu0 }
 0x12d   :  { %v428_v21 = vpop.f32.mrb[1].mxu0  ;;  %v177_v23 = vmax.f32 %v170_v20, 0.0 }
 0x12e   :  { %v173_v22 = vpop.f32.mrb[2].mxu0 }
 0x12f   :  { %v178_v24 = vmax.f32 %v173_v22, 0.0  ;;  %v429_v25 = vpop.f32.mrb[3].mxu0 }
 0x131   :  { %v179_v26 = vpack.c.bf16 %v178_v24, %v177_v23 }
 0x133   :  { %447 = vmatmul.mubr.bf16.vlgmr.msra.gmra.mrb[0].mxu1 %v179_v26 }
 0x206   :  { %v278_v27 = vpop.f32.mrb[0].mxu1 }
 0x207   :  { %v448_v28 = vpop.f32.mrb[1].mxu1  ;;  %v307_v29 = vadd.f32 %v278_v27, %v67_v14 }
 0x208   :  { %v281_v30 = vpop.f32.mrb[2].mxu1 }
 0x209   :  { %v449_v31 = vpop.f32.mrb[3].mxu1  ;;  %309 = vadd.xlane.f32.xlu0 %v307_v29  ;;  %v308_v32 = vadd.f32 %v281_v30, %v68_v15 }
 0x20d   :  { %311 = vadd.xlane.f32.xlu0 %v308_v32 }
 0x296   :  { %v310_v35 = vpop.xlane.xlu0 %309 }
 0x297   :  { %v313_v36 = vmul.f32 0.03125, %v310_v35 }
 0x299   :  { %v315_v37 = vsub.f32 %v307_v29, %v313_v36 }
 0x29a   :  { %v312_v38 = vpop.xlane.xlu0 %311 }
 0x29b   :  { %v314_v39 = vmul.f32 0.03125, %v312_v38  ;;  %v320_v40 = vsel %vm319_vm1, %v315_v37, 0.0 }
 0x29c   :  { %v322_v41 = vmul.f32 %v320_v40, %v320_v40 }
 0x29d   :  { %v316_v42 = vsub.f32 %v308_v32, %v314_v39 }
 0x29e   :  { %324 = vadd.xlane.f32.xlu1 %v322_v41 }
 0x29f   :  { %v321_v43 = vsel %vm319_vm1, %v316_v42, 0.0 }
 0x2a0   :  { %v323_v44 = vmul.f32 %v321_v43, %v321_v43 }
 0x2a2   :  { %326 = vadd.xlane.f32.xlu1 %v323_v44 }
 0x32b   :  { %v325_v45 = vpop.xlane.xlu1 %324 }
 0x32c   :  { %v328_v46 = vmul.f32 0.03125, %v325_v45 }
 0x32e   :  { %v330_v47 = vadd.f32 1e-05, %v328_v46 }
 0x32f   :  { %v327_v48 = vpop.xlane.xlu1 %326 }
 0x330   :  { %476 = vrsqrt.f32 %v330_v47  ;;  %v329_v49 = vmul.f32 0.03125, %v327_v48 }
 0x332   :  { %v331_v50 = vadd.f32 1e-05, %v329_v49 }
 0x334   :  { %478 = vrsqrt.f32 %v331_v50 }
 0x33a   :  { %v477_v51 = vpop.eup %476 }
 0x33b   :  { %v334_v53 = vmul.f32 %v477_v51, %v320_v40 }
 0x33d   :  { %v343_v55 = vmul.f32 %v390_v52, %v334_v53 }
 0x33e   :  { %v479_v56 = vpop.eup %478 }
 0x33f   :  { %v335_v57 = vmul.f32 %v479_v56, %v321_v43  ;;  %v352_v58 = vadd.f32 %v391_v54, %v343_v55 }
 0x341   :  { %v344_v59 = vmul.f32 %v390_v52, %v335_v57  ;;  %354 = vst [vmem:[#allocation9] sm:$0xff] %v352_v58 }
 0x343   :  { %v353_v60 = vadd.f32 %v391_v54, %v344_v59 }
 0x345   :  { %355 = vst [vmem:[#allocation9 + $0x8] sm:$0xff] %v353_v60 }
 0x346   :  { %557 = shalt.err (!%p554_p0)
}
 0x347   :  { %s558_s12 = scalar_lea.hbm %s685_s5, 256 }
 0x348   :  { %p559_p1 = scmp.ne.s32.totalorder %s685_s5, %s558_s12  ;;  %p562_p2 = scmp.lt.u32.totalorder %s558_s12, %s685_s5 }
 0x34a   :  { %p564_p3 = pnand %p562_p2, %p559_p1 }
 0x34c   :  { %567 = shalt.err (!%p564_p3)
}
 0x34d   :  { %367 = dma.vmem_to_hbm [thread:$0]  %s362_s10, 256, %s685_s5, [#allocation5], %s578_s1, %s578_s1, %s579_s17  }
 0x34e   :  { %572 = dma.done.wait [#allocation5], 256  }
 0x34f   :  { %573 = vsyncadd [#allocation5], 4294967040 }
 0x350   :  { %371 = vsyncpa [#allocation4], 1 }
 0x351   :  { %372 = vsyncpa [#allocation7], 1 }
 0x352   :  { %373 = vsyncpa [#allocation5], 1 }

</bundles_post_ra>
